<compile_context>
chip_gen: v6e
topology: v6e:2x2x1
jax: 0.10.0
libtpu: 0.0.40
codegen_flags: <defaults>
</compile_context>

<pallas_src>
import math
from functools import partial

import jax
import jax.numpy as jnp
from jax.experimental import pallas as pl
from jax.experimental.pallas import tpu as pltpu


# ----------------------------------------------------------------------------
# Fused AttentionLayer kernel (one grid step == one batch element)
# ----------------------------------------------------------------------------
def _attention_layer_kernel(q_in, k_in, v_in,
                            wq_ref, bq_ref, wk_ref, bk_ref,
                            wv_ref, bv_ref, wo_ref, bo_ref,
                            o_ref, *, n_heads, d_head, d_val, scale):
    L = q_in.shape[1]
    d_model = o_ref.shape[2]

    xq = q_in[0]          # (L, d_model)
    xk = k_in[0]          # (S, d_model)
    xv = v_in[0]          # (S, d_model)

    # Q/K/V projections on the MXU, f32 accumulation.  1/sqrt(E) folded into q.
    q = (jnp.dot(xq, wq_ref[...], preferred_element_type=jnp.float32)
         + bq_ref[...]) * scale                                   # (L, H*E)
    k = jnp.dot(xk, wk_ref[...], preferred_element_type=jnp.float32) + bk_ref[...]
    v = jnp.dot(xv, wv_ref[...], preferred_element_type=jnp.float32) + bv_ref[...]

    wo = wo_ref[...]      # (H*Dv, d_model)

    # Per-head attention; head-concat + output projection fused as a sum of
    # per-head contributions (static unrolled loop — all ops are 2-D).
    acc = jnp.zeros((L, d_model), jnp.float32)
    for h in range(n_heads):
        qh = q[:, h * d_head:(h + 1) * d_head]                     # (L, E)
        kh = k[:, h * d_head:(h + 1) * d_head]                     # (S, E)
        vh = v[:, h * d_val:(h + 1) * d_val]                       # (S, Dv)

        s = jnp.dot(qh, kh.T, preferred_element_type=jnp.float32)  # (L, S)
        s = s - jnp.max(s, axis=-1, keepdims=True)
        p = jnp.exp(s)
        p = p * pl.reciprocal(jnp.sum(p, axis=-1, keepdims=True), approx=True)

        oh = jnp.dot(p, vh, preferred_element_type=jnp.float32)    # (L, Dv)
        acc = acc + jnp.dot(oh, wo[h * d_val:(h + 1) * d_val, :],
                            preferred_element_type=jnp.float32)    # (L, d_model)

    o_ref[0] = (acc + bo_ref[...]).astype(o_ref.dtype)


# ----------------------------------------------------------------------------
# Parameters + forward wrapper
# ----------------------------------------------------------------------------
def init_attention_layer_params(key, d_model, n_heads, d_keys=None, d_values=None,
                                dtype=jnp.float32):
    d_keys = d_keys or d_model // n_heads
    d_values = d_values or d_model // n_heads
    ks = jax.random.split(key, 8)

    def lin_init(kw, kb, fan_in, fan_out):
        bound = 1.0 / math.sqrt(fan_in)  # PyTorch nn.Linear default init
        w = jax.random.uniform(kw, (fan_in, fan_out), dtype, -bound, bound)
        b = jax.random.uniform(kb, (fan_out,), dtype, -bound, bound)
        return w, b

    return {
        "q_proj": lin_init(ks[0], ks[1], d_model, d_keys * n_heads),
        "k_proj": lin_init(ks[2], ks[3], d_model, d_keys * n_heads),
        "v_proj": lin_init(ks[4], ks[5], d_model, d_values * n_heads),
        "o_proj": lin_init(ks[6], ks[7], d_values * n_heads, d_model),
        "n_heads": n_heads,
    }


def attention_layer_forward(params, queries, keys, values, attn_mask=None,
                            tau=None, delta=None):
    B, L, d_model = queries.shape
    _, S, _ = keys.shape
    H = params["n_heads"]

    wq, bq = params["q_proj"]
    wk, bk = params["k_proj"]
    wv, bv = params["v_proj"]
    wo, bo = params["o_proj"]

    HE = wq.shape[1]          # H * d_keys
    HDv = wv.shape[1]         # H * d_values
    E = HE // H
    Dv = HDv // H
    scale = 1.0 / math.sqrt(E)

    bq2 = bq.reshape(1, HE)
    bk2 = bk.reshape(1, HE)
    bv2 = bv.reshape(1, HDv)
    bo2 = bo.reshape(1, d_model)

    # Advisory cost estimate for XLA scheduling.
    flops = int(B * (2 * L * d_model * HE + 2 * S * d_model * HE
                     + 2 * S * d_model * HDv
                     + 2 * H * L * S * E + 2 * H * L * S * Dv
                     + 2 * L * HDv * d_model))
    transcendentals = int(B * (H * L * S + H * L))
    bytes_accessed = int(4 * (2 * B * L * d_model + 2 * B * S * d_model
                              + 2 * d_model * HE + d_model * HDv
                              + HDv * d_model + 2 * HE + HDv + d_model))

    kernel = partial(_attention_layer_kernel,
                     n_heads=H, d_head=E, d_val=Dv, scale=scale)

    out = pl.pallas_call(
        kernel,
        out_shape=jax.ShapeDtypeStruct((B, L, d_model), queries.dtype),
        grid=(B,),
        in_specs=[
            pl.BlockSpec((1, L, d_model), lambda b: (b, 0, 0)),   # queries
            pl.BlockSpec((1, S, d_model), lambda b: (b, 0, 0)),   # keys
            pl.BlockSpec((1, S, d_model), lambda b: (b, 0, 0)),   # values
            pl.BlockSpec((d_model, HE), lambda b: (0, 0)),        # Wq
            pl.BlockSpec((1, HE), lambda b: (0, 0)),              # bq
            pl.BlockSpec((d_model, HE), lambda b: (0, 0)),        # Wk
            pl.BlockSpec((1, HE), lambda b: (0, 0)),              # bk
            pl.BlockSpec((d_model, HDv), lambda b: (0, 0)),       # Wv
            pl.BlockSpec((1, HDv), lambda b: (0, 0)),             # bv
            pl.BlockSpec((HDv, d_model), lambda b: (0, 0)),       # Wo
            pl.BlockSpec((1, d_model), lambda b: (0, 0)),         # bo
        ],
        out_specs=pl.BlockSpec((1, L, d_model), lambda b: (b, 0, 0)),
        compiler_params=pltpu.CompilerParams(
            dimension_semantics=("parallel",)),
        cost_estimate=pl.CostEstimate(flops=flops,
                                      transcendentals=transcendentals,
                                      bytes_accessed=bytes_accessed),
    )(queries, keys, values, wq, bq2, wk, bk2, wv, bv2, wo, bo2)

    attn = None  # output_attention=False in iTransformer's FullAttention
    return out, attn


# ----------------------------------------------------------------------------
# Reference (plain JAX) for sanity checking
# ----------------------------------------------------------------------------
def reference_forward(params, queries, keys, values):
    B, L, d_model = queries.shape
    _, S, _ = keys.shape
    H = params["n_heads"]
    wq, bq = params["q_proj"]
    wk, bk = params["k_proj"]
    wv, bv = params["v_proj"]
    wo, bo = params["o_proj"]

    q = (queries @ wq + bq).reshape(B, L, H, -1)
    k = (keys @ wk + bk).reshape(B, S, H, -1)
    v = (values @ wv + bv).reshape(B, S, H, -1)
    E = q.shape[-1]
    scores = jnp.einsum("blhe,bshe->bhls", q, k) / math.sqrt(E)
    attn = jax.nn.softmax(scores, axis=-1)
    out = jnp.einsum("bhls,bshd->blhd", attn, v).reshape(B, L, -1)
    return out @ wo + bo


# ----------------------------------------------------------------------------
if __name__ == "__main__":
    key = jax.random.PRNGKey(0)
    k_params, k_q, k_k, k_v = jax.random.split(key, 4)

    B, L, S, d_model, n_heads = 2, 8, 8, 32, 4

    params = init_attention_layer_params(k_params, d_model, n_heads)

    queries = jax.random.normal(k_q, (B, L, d_model), jnp.float32)
    keys = jax.random.normal(k_k, (B, S, d_model), jnp.float32)
    values = jax.random.normal(k_v, (B, S, d_model), jnp.float32)

    out, attn = attention_layer_forward(params, queries, keys, values, attn_mask=None)
    out = jax.block_until_ready(out)

    ref = reference_forward(params, queries, keys, values)
    assert out.shape == (B, L, d_model)
    assert attn is None
    # Slightly loosened tolerance: softmax denominator uses the EUP approx
    # reciprocal (pl.reciprocal(..., approx=True)).
    assert jnp.allclose(out, ref, atol=5e-3, rtol=5e-3), "mismatch vs reference"

    print("KERNEL_OK")
</pallas_src>

<mosaic_0001>
module attributes {stable_mosaic.version = 11 : i64} {
  func.func @_attention_layer_kernel(%arg0: i32, %arg1: memref<1x8x32xf32, #tpu.memory_space<vmem>>, %arg2: memref<1x8x32xf32, #tpu.memory_space<vmem>>, %arg3: memref<1x8x32xf32, #tpu.memory_space<vmem>>, %arg4: memref<32x32xf32, #tpu.memory_space<vmem>>, %arg5: memref<1x32xf32, #tpu.memory_space<vmem>>, %arg6: memref<32x32xf32, #tpu.memory_space<vmem>>, %arg7: memref<1x32xf32, #tpu.memory_space<vmem>>, %arg8: memref<32x32xf32, #tpu.memory_space<vmem>>, %arg9: memref<1x32xf32, #tpu.memory_space<vmem>>, %arg10: memref<32x32xf32, #tpu.memory_space<vmem>>, %arg11: memref<1x32xf32, #tpu.memory_space<vmem>>, %arg12: memref<1x8x32xf32, #tpu.memory_space<vmem>>) attributes {dimension_semantics = [#tpu.dimension_semantics<parallel>], iteration_bounds = array<i64: 2>, scalar_prefetch = 0 : i64, scratch_operands = 0 : i64, tpu.core_type = #tpu.core_type<tc>, window_params = [{transform_indices = @transform_0, window_bounds = array<i64: 1, 8, 32>}, {transform_indices = @transform_1, window_bounds = array<i64: 1, 8, 32>}, {transform_indices = @transform_2, window_bounds = array<i64: 1, 8, 32>}, {pipeline_mode = #tpu.pipeline_mode<synchronous>, transform_indices = @transform_3, window_bounds = array<i64: 32, 32>}, {pipeline_mode = #tpu.pipeline_mode<synchronous>, transform_indices = @transform_4, window_bounds = array<i64: 1, 32>}, {pipeline_mode = #tpu.pipeline_mode<synchronous>, transform_indices = @transform_5, window_bounds = array<i64: 32, 32>}, {pipeline_mode = #tpu.pipeline_mode<synchronous>, transform_indices = @transform_6, window_bounds = array<i64: 1, 32>}, {pipeline_mode = #tpu.pipeline_mode<synchronous>, transform_indices = @transform_7, window_bounds = array<i64: 32, 32>}, {pipeline_mode = #tpu.pipeline_mode<synchronous>, transform_indices = @transform_8, window_bounds = array<i64: 1, 32>}, {pipeline_mode = #tpu.pipeline_mode<synchronous>, transform_indices = @transform_9, window_bounds = array<i64: 32, 32>}, {pipeline_mode = #tpu.pipeline_mode<synchronous>, transform_indices = @transform_10, window_bounds = array<i64: 1, 32>}, {transform_indices = @transform_11, window_bounds = array<i64: 1, 8, 32>}]} {
    %c0 = arith.constant 0 : index
    %c0_0 = arith.constant 0 : index
    %c0_1 = arith.constant 0 : index
    %0 = vector.load %arg1[%c0, %c0_0, %c0_1] : memref<1x8x32xf32, #tpu.memory_space<vmem>>, vector<1x8x32xf32>
    %1 = vector.shape_cast %0 : vector<1x8x32xf32> to vector<8x32xf32>
    %c0_2 = arith.constant 0 : index
    %c0_3 = arith.constant 0 : index
    %c0_4 = arith.constant 0 : index
    %2 = vector.load %arg2[%c0_2, %c0_3, %c0_4] : memref<1x8x32xf32, #tpu.memory_space<vmem>>, vector<1x8x32xf32>
    %3 = vector.shape_cast %2 : vector<1x8x32xf32> to vector<8x32xf32>
    %c0_5 = arith.constant 0 : index
    %c0_6 = arith.constant 0 : index
    %c0_7 = arith.constant 0 : index
    %4 = vector.load %arg3[%c0_5, %c0_6, %c0_7] : memref<1x8x32xf32, #tpu.memory_space<vmem>>, vector<1x8x32xf32>
    %5 = vector.shape_cast %4 : vector<1x8x32xf32> to vector<8x32xf32>
    %c0_8 = arith.constant 0 : index
    %c0_9 = arith.constant 0 : index
    %6 = vector.load %arg4[%c0_8, %c0_9] : memref<32x32xf32, #tpu.memory_space<vmem>>, vector<32x32xf32>
    %cst = arith.constant dense<0.000000e+00> : vector<8x32xf32>
    %7 = tpu.matmul %1, %6, %cst {dimension_numbers = #tpu.dot_dimension_numbers<[1], [0], [0], [1], [0, 0, 1, 1], [], []>} : vector<8x32xf32>, vector<32x32xf32>, vector<8x32xf32> -> vector<8x32xf32>
    %c0_10 = arith.constant 0 : index
    %c0_11 = arith.constant 0 : index
    %8 = vector.load %arg5[%c0_10, %c0_11] : memref<1x32xf32, #tpu.memory_space<vmem>>, vector<1x32xf32>
    %9 = vector.broadcast %8 : vector<1x32xf32> to vector<8x32xf32>
    %10 = arith.addf %7, %9 : vector<8x32xf32>
    %cst_12 = arith.constant 0.353553385 : f32
    %11 = vector.broadcast %cst_12 : f32 to vector<8x32xf32>
    %12 = arith.mulf %10, %11 : vector<8x32xf32>
    %c0_13 = arith.constant 0 : index
    %c0_14 = arith.constant 0 : index
    %13 = vector.load %arg6[%c0_13, %c0_14] : memref<32x32xf32, #tpu.memory_space<vmem>>, vector<32x32xf32>
    %cst_15 = arith.constant dense<0.000000e+00> : vector<8x32xf32>
    %14 = tpu.matmul %3, %13, %cst_15 {dimension_numbers = #tpu.dot_dimension_numbers<[1], [0], [0], [1], [0, 0, 1, 1], [], []>} : vector<8x32xf32>, vector<32x32xf32>, vector<8x32xf32> -> vector<8x32xf32>
    %c0_16 = arith.constant 0 : index
    %c0_17 = arith.constant 0 : index
    %15 = vector.load %arg7[%c0_16, %c0_17] : memref<1x32xf32, #tpu.memory_space<vmem>>, vector<1x32xf32>
    %16 = vector.broadcast %15 : vector<1x32xf32> to vector<8x32xf32>
    %17 = arith.addf %14, %16 : vector<8x32xf32>
    %c0_18 = arith.constant 0 : index
    %c0_19 = arith.constant 0 : index
    %18 = vector.load %arg8[%c0_18, %c0_19] : memref<32x32xf32, #tpu.memory_space<vmem>>, vector<32x32xf32>
    %cst_20 = arith.constant dense<0.000000e+00> : vector<8x32xf32>
    %19 = tpu.matmul %5, %18, %cst_20 {dimension_numbers = #tpu.dot_dimension_numbers<[1], [0], [0], [1], [0, 0, 1, 1], [], []>} : vector<8x32xf32>, vector<32x32xf32>, vector<8x32xf32> -> vector<8x32xf32>
    %c0_21 = arith.constant 0 : index
    %c0_22 = arith.constant 0 : index
    %20 = vector.load %arg9[%c0_21, %c0_22] : memref<1x32xf32, #tpu.memory_space<vmem>>, vector<1x32xf32>
    %21 = vector.broadcast %20 : vector<1x32xf32> to vector<8x32xf32>
    %22 = arith.addf %19, %21 : vector<8x32xf32>
    %c0_23 = arith.constant 0 : index
    %c0_24 = arith.constant 0 : index
    %23 = vector.load %arg10[%c0_23, %c0_24] : memref<32x32xf32, #tpu.memory_space<vmem>>, vector<32x32xf32>
    %cst_25 = arith.constant 0.000000e+00 : f32
    %24 = vector.broadcast %cst_25 : f32 to vector<8x32xf32>
    %25 = vector.extract_strided_slice %12 {offsets = [0, 0], sizes = [8, 8], strides = [1, 1]} : vector<8x32xf32> to vector<8x8xf32>
    %26 = vector.extract_strided_slice %17 {offsets = [0, 0], sizes = [8, 8], strides = [1, 1]} : vector<8x32xf32> to vector<8x8xf32>
    %27 = vector.extract_strided_slice %22 {offsets = [0, 0], sizes = [8, 8], strides = [1, 1]} : vector<8x32xf32> to vector<8x8xf32>
    %28 = tpu.transpose %26, [1, 0] : vector<8x8xf32> -> vector<8x8xf32>
    %cst_26 = arith.constant dense<0.000000e+00> : vector<8x8xf32>
    %29 = tpu.matmul %25, %28, %cst_26 {dimension_numbers = #tpu.dot_dimension_numbers<[1], [0], [0], [1], [0, 0, 1, 1], [], []>} : vector<8x8xf32>, vector<8x8xf32>, vector<8x8xf32> -> vector<8x8xf32>
    %cst_27 = arith.constant dense<0xFF800000> : vector<8xf32>
    %30 = vector.multi_reduction <maximumf>, %29, %cst_27 [1] : vector<8x8xf32> to vector<8xf32>
    %31 = vector.shape_cast %30 : vector<8xf32> to vector<8x1xf32>
    %32 = vector.broadcast %31 : vector<8x1xf32> to vector<8x8xf32>
    %33 = arith.subf %29, %32 : vector<8x8xf32>
    %34 = math.exp %33 : vector<8x8xf32>
    %cst_28 = arith.constant dense<0.000000e+00> : vector<8xf32>
    %35 = vector.multi_reduction <add>, %34, %cst_28 [1] : vector<8x8xf32> to vector<8xf32>
    %36 = vector.shape_cast %35 : vector<8xf32> to vector<8x1xf32>
    %37 = tpu.reciprocal %36 {approx = true} : vector<8x1xf32> -> vector<8x1xf32>
    %38 = vector.broadcast %37 : vector<8x1xf32> to vector<8x8xf32>
    %39 = arith.mulf %34, %38 : vector<8x8xf32>
    %cst_29 = arith.constant dense<0.000000e+00> : vector<8x8xf32>
    %40 = tpu.matmul %39, %27, %cst_29 {dimension_numbers = #tpu.dot_dimension_numbers<[1], [0], [0], [1], [0, 0, 1, 1], [], []>} : vector<8x8xf32>, vector<8x8xf32>, vector<8x8xf32> -> vector<8x8xf32>
    %41 = vector.extract_strided_slice %23 {offsets = [0, 0], sizes = [8, 32], strides = [1, 1]} : vector<32x32xf32> to vector<8x32xf32>
    %cst_30 = arith.constant dense<0.000000e+00> : vector<8x32xf32>
    %42 = tpu.matmul %40, %41, %cst_30 {dimension_numbers = #tpu.dot_dimension_numbers<[1], [0], [0], [1], [0, 0, 1, 1], [], []>} : vector<8x8xf32>, vector<8x32xf32>, vector<8x32xf32> -> vector<8x32xf32>
    %43 = arith.addf %24, %42 : vector<8x32xf32>
    %44 = vector.extract_strided_slice %12 {offsets = [0, 8], sizes = [8, 8], strides = [1, 1]} : vector<8x32xf32> to vector<8x8xf32>
    %45 = vector.extract_strided_slice %17 {offsets = [0, 8], sizes = [8, 8], strides = [1, 1]} : vector<8x32xf32> to vector<8x8xf32>
    %46 = vector.extract_strided_slice %22 {offsets = [0, 8], sizes = [8, 8], strides = [1, 1]} : vector<8x32xf32> to vector<8x8xf32>
    %47 = tpu.transpose %45, [1, 0] : vector<8x8xf32> -> vector<8x8xf32>
    %cst_31 = arith.constant dense<0.000000e+00> : vector<8x8xf32>
    %48 = tpu.matmul %44, %47, %cst_31 {dimension_numbers = #tpu.dot_dimension_numbers<[1], [0], [0], [1], [0, 0, 1, 1], [], []>} : vector<8x8xf32>, vector<8x8xf32>, vector<8x8xf32> -> vector<8x8xf32>
    %cst_32 = arith.constant dense<0xFF800000> : vector<8xf32>
    %49 = vector.multi_reduction <maximumf>, %48, %cst_32 [1] : vector<8x8xf32> to vector<8xf32>
    %50 = vector.shape_cast %49 : vector<8xf32> to vector<8x1xf32>
    %51 = vector.broadcast %50 : vector<8x1xf32> to vector<8x8xf32>
    %52 = arith.subf %48, %51 : vector<8x8xf32>
    %53 = math.exp %52 : vector<8x8xf32>
    %cst_33 = arith.constant dense<0.000000e+00> : vector<8xf32>
    %54 = vector.multi_reduction <add>, %53, %cst_33 [1] : vector<8x8xf32> to vector<8xf32>
    %55 = vector.shape_cast %54 : vector<8xf32> to vector<8x1xf32>
    %56 = tpu.reciprocal %55 {approx = true} : vector<8x1xf32> -> vector<8x1xf32>
    %57 = vector.broadcast %56 : vector<8x1xf32> to vector<8x8xf32>
    %58 = arith.mulf %53, %57 : vector<8x8xf32>
    %cst_34 = arith.constant dense<0.000000e+00> : vector<8x8xf32>
    %59 = tpu.matmul %58, %46, %cst_34 {dimension_numbers = #tpu.dot_dimension_numbers<[1], [0], [0], [1], [0, 0, 1, 1], [], []>} : vector<8x8xf32>, vector<8x8xf32>, vector<8x8xf32> -> vector<8x8xf32>
    %60 = vector.extract_strided_slice %23 {offsets = [8, 0], sizes = [8, 32], strides = [1, 1]} : vector<32x32xf32> to vector<8x32xf32>
    %cst_35 = arith.constant dense<0.000000e+00> : vector<8x32xf32>
    %61 = tpu.matmul %59, %60, %cst_35 {dimension_numbers = #tpu.dot_dimension_numbers<[1], [0], [0], [1], [0, 0, 1, 1], [], []>} : vector<8x8xf32>, vector<8x32xf32>, vector<8x32xf32> -> vector<8x32xf32>
    %62 = arith.addf %43, %61 : vector<8x32xf32>
    %63 = vector.extract_strided_slice %12 {offsets = [0, 16], sizes = [8, 8], strides = [1, 1]} : vector<8x32xf32> to vector<8x8xf32>
    %64 = vector.extract_strided_slice %17 {offsets = [0, 16], sizes = [8, 8], strides = [1, 1]} : vector<8x32xf32> to vector<8x8xf32>
    %65 = vector.extract_strided_slice %22 {offsets = [0, 16], sizes = [8, 8], strides = [1, 1]} : vector<8x32xf32> to vector<8x8xf32>
    %66 = tpu.transpose %64, [1, 0] : vector<8x8xf32> -> vector<8x8xf32>
    %cst_36 = arith.constant dense<0.000000e+00> : vector<8x8xf32>
    %67 = tpu.matmul %63, %66, %cst_36 {dimension_numbers = #tpu.dot_dimension_numbers<[1], [0], [0], [1], [0, 0, 1, 1], [], []>} : vector<8x8xf32>, vector<8x8xf32>, vector<8x8xf32> -> vector<8x8xf32>
    %cst_37 = arith.constant dense<0xFF800000> : vector<8xf32>
    %68 = vector.multi_reduction <maximumf>, %67, %cst_37 [1] : vector<8x8xf32> to vector<8xf32>
    %69 = vector.shape_cast %68 : vector<8xf32> to vector<8x1xf32>
    %70 = vector.broadcast %69 : vector<8x1xf32> to vector<8x8xf32>
    %71 = arith.subf %67, %70 : vector<8x8xf32>
    %72 = math.exp %71 : vector<8x8xf32>
    %cst_38 = arith.constant dense<0.000000e+00> : vector<8xf32>
    %73 = vector.multi_reduction <add>, %72, %cst_38 [1] : vector<8x8xf32> to vector<8xf32>
    %74 = vector.shape_cast %73 : vector<8xf32> to vector<8x1xf32>
    %75 = tpu.reciprocal %74 {approx = true} : vector<8x1xf32> -> vector<8x1xf32>
    %76 = vector.broadcast %75 : vector<8x1xf32> to vector<8x8xf32>
    %77 = arith.mulf %72, %76 : vector<8x8xf32>
    %cst_39 = arith.constant dense<0.000000e+00> : vector<8x8xf32>
    %78 = tpu.matmul %77, %65, %cst_39 {dimension_numbers = #tpu.dot_dimension_numbers<[1], [0], [0], [1], [0, 0, 1, 1], [], []>} : vector<8x8xf32>, vector<8x8xf32>, vector<8x8xf32> -> vector<8x8xf32>
    %79 = vector.extract_strided_slice %23 {offsets = [16, 0], sizes = [8, 32], strides = [1, 1]} : vector<32x32xf32> to vector<8x32xf32>
    %cst_40 = arith.constant dense<0.000000e+00> : vector<8x32xf32>
    %80 = tpu.matmul %78, %79, %cst_40 {dimension_numbers = #tpu.dot_dimension_numbers<[1], [0], [0], [1], [0, 0, 1, 1], [], []>} : vector<8x8xf32>, vector<8x32xf32>, vector<8x32xf32> -> vector<8x32xf32>
    %81 = arith.addf %62, %80 : vector<8x32xf32>
    %82 = vector.extract_strided_slice %12 {offsets = [0, 24], sizes = [8, 8], strides = [1, 1]} : vector<8x32xf32> to vector<8x8xf32>
    %83 = vector.extract_strided_slice %17 {offsets = [0, 24], sizes = [8, 8], strides = [1, 1]} : vector<8x32xf32> to vector<8x8xf32>
    %84 = vector.extract_strided_slice %22 {offsets = [0, 24], sizes = [8, 8], strides = [1, 1]} : vector<8x32xf32> to vector<8x8xf32>
    %85 = tpu.transpose %83, [1, 0] : vector<8x8xf32> -> vector<8x8xf32>
    %cst_41 = arith.constant dense<0.000000e+00> : vector<8x8xf32>
    %86 = tpu.matmul %82, %85, %cst_41 {dimension_numbers = #tpu.dot_dimension_numbers<[1], [0], [0], [1], [0, 0, 1, 1], [], []>} : vector<8x8xf32>, vector<8x8xf32>, vector<8x8xf32> -> vector<8x8xf32>
    %cst_42 = arith.constant dense<0xFF800000> : vector<8xf32>
    %87 = vector.multi_reduction <maximumf>, %86, %cst_42 [1] : vector<8x8xf32> to vector<8xf32>
    %88 = vector.shape_cast %87 : vector<8xf32> to vector<8x1xf32>
    %89 = vector.broadcast %88 : vector<8x1xf32> to vector<8x8xf32>
    %90 = arith.subf %86, %89 : vector<8x8xf32>
    %91 = math.exp %90 : vector<8x8xf32>
    %cst_43 = arith.constant dense<0.000000e+00> : vector<8xf32>
    %92 = vector.multi_reduction <add>, %91, %cst_43 [1] : vector<8x8xf32> to vector<8xf32>
    %93 = vector.shape_cast %92 : vector<8xf32> to vector<8x1xf32>
    %94 = tpu.reciprocal %93 {approx = true} : vector<8x1xf32> -> vector<8x1xf32>
    %95 = vector.broadcast %94 : vector<8x1xf32> to vector<8x8xf32>
    %96 = arith.mulf %91, %95 : vector<8x8xf32>
    %cst_44 = arith.constant dense<0.000000e+00> : vector<8x8xf32>
    %97 = tpu.matmul %96, %84, %cst_44 {dimension_numbers = #tpu.dot_dimension_numbers<[1], [0], [0], [1], [0, 0, 1, 1], [], []>} : vector<8x8xf32>, vector<8x8xf32>, vector<8x8xf32> -> vector<8x8xf32>
    %98 = vector.extract_strided_slice %23 {offsets = [24, 0], sizes = [8, 32], strides = [1, 1]} : vector<32x32xf32> to vector<8x32xf32>
    %cst_45 = arith.constant dense<0.000000e+00> : vector<8x32xf32>
    %99 = tpu.matmul %97, %98, %cst_45 {dimension_numbers = #tpu.dot_dimension_numbers<[1], [0], [0], [1], [0, 0, 1, 1], [], []>} : vector<8x8xf32>, vector<8x32xf32>, vector<8x32xf32> -> vector<8x32xf32>
    %100 = arith.addf %81, %99 : vector<8x32xf32>
    %c0_46 = arith.constant 0 : index
    %c0_47 = arith.constant 0 : index
    %101 = vector.load %arg11[%c0_46, %c0_47] : memref<1x32xf32, #tpu.memory_space<vmem>>, vector<1x32xf32>
    %102 = vector.broadcast %101 : vector<1x32xf32> to vector<8x32xf32>
    %103 = arith.addf %100, %102 : vector<8x32xf32>
    %c0_48 = arith.constant 0 : index
    %c0_49 = arith.constant 0 : index
    %c0_50 = arith.constant 0 : index
    %104 = vector.load %arg12[%c0_48, %c0_49, %c0_50] : memref<1x8x32xf32, #tpu.memory_space<vmem>>, vector<1x8x32xf32>
    %105 = vector.shape_cast %104 : vector<1x8x32xf32> to vector<8x32xf32>
    %106 = vector.shape_cast %103 : vector<8x32xf32> to vector<1x8x32xf32>
    tpu.vector_store %arg12[%c0_48, %c0_49, %c0_50], %106 {strides = array<i32>} : memref<1x8x32xf32, #tpu.memory_space<vmem>>, vector<1x8x32xf32>,
    return
  }
  func.func @transform_0(%arg0: i32) -> (i32, i32, i32) {
    %c0_i32 = arith.constant 0 : i32
    %c0_i32_0 = arith.constant 0 : i32
    %c0_i32_1 = arith.constant 0 : i32
    return %arg0, %c0_i32, %c0_i32_0 : i32, i32, i32
  }
  func.func @transform_1(%arg0: i32) -> (i32, i32, i32) {
    %c0_i32 = arith.constant 0 : i32
    %c0_i32_0 = arith.constant 0 : i32
    %c0_i32_1 = arith.constant 0 : i32
    return %arg0, %c0_i32, %c0_i32_0 : i32, i32, i32
  }
  func.func @transform_2(%arg0: i32) -> (i32, i32, i32) {
    %c0_i32 = arith.constant 0 : i32
    %c0_i32_0 = arith.constant 0 : i32
    %c0_i32_1 = arith.constant 0 : i32
    return %arg0, %c0_i32, %c0_i32_0 : i32, i32, i32
  }
  func.func @transform_3(%arg0: i32) -> (i32, i32) {
    %c0_i32 = arith.constant 0 : i32
    %c0_i32_0 = arith.constant 0 : i32
    %c0_i32_1 = arith.constant 0 : i32
    return %c0_i32, %c0_i32_0 : i32, i32
  }
  func.func @transform_4(%arg0: i32) -> (i32, i32) {
    %c0_i32 = arith.constant 0 : i32
    %c0_i32_0 = arith.constant 0 : i32
    %c0_i32_1 = arith.constant 0 : i32
    return %c0_i32, %c0_i32_0 : i32, i32
  }
  func.func @transform_5(%arg0: i32) -> (i32, i32) {
    %c0_i32 = arith.constant 0 : i32
    %c0_i32_0 = arith.constant 0 : i32
    %c0_i32_1 = arith.constant 0 : i32
    return %c0_i32, %c0_i32_0 : i32, i32
  }
  func.func @transform_6(%arg0: i32) -> (i32, i32) {
    %c0_i32 = arith.constant 0 : i32
    %c0_i32_0 = arith.constant 0 : i32
    %c0_i32_1 = arith.constant 0 : i32
    return %c0_i32, %c0_i32_0 : i32, i32
  }
  func.func @transform_7(%arg0: i32) -> (i32, i32) {
    %c0_i32 = arith.constant 0 : i32
    %c0_i32_0 = arith.constant 0 : i32
    %c0_i32_1 = arith.constant 0 : i32
    return %c0_i32, %c0_i32_0 : i32, i32
  }
  func.func @transform_8(%arg0: i32) -> (i32, i32) {
    %c0_i32 = arith.constant 0 : i32
    %c0_i32_0 = arith.constant 0 : i32
    %c0_i32_1 = arith.constant 0 : i32
    return %c0_i32, %c0_i32_0 : i32, i32
  }
  func.func @transform_9(%arg0: i32) -> (i32, i32) {
    %c0_i32 = arith.constant 0 : i32
    %c0_i32_0 = arith.constant 0 : i32
    %c0_i32_1 = arith.constant 0 : i32
    return %c0_i32, %c0_i32_0 : i32, i32
  }
  func.func @transform_10(%arg0: i32) -> (i32, i32) {
    %c0_i32 = arith.constant 0 : i32
    %c0_i32_0 = arith.constant 0 : i32
    %c0_i32_1 = arith.constant 0 : i32
    return %c0_i32, %c0_i32_0 : i32, i32
  }
  func.func @transform_11(%arg0: i32) -> (i32, i32, i32) {
    %c0_i32 = arith.constant 0 : i32
    %c0_i32_0 = arith.constant 0 : i32
    %c0_i32_1 = arith.constant 0 : i32
    return %arg0, %c0_i32, %c0_i32_0 : i32, i32, i32
  }
}

</mosaic_0001>

<bundles_post_ra>
// kernel: tpu_custom_call.1
= control target key start
LH: loop header
LB: loop body
LE: loop exit
PB: predicated region body
PF: predicated region fallthrough
CT: control target
= control target key end

     0   :  { %s2958_s0 = inlined_call_operand.hbm [shape: f32[2,8,32], index: 0, kind: input, shape index: {}]   ;;  %s2959_s1 = inlined_call_operand.hbm [shape: f32[2,8,32], index: 1, kind: input, shape index: {}]   ;;  %s2960_s2 = inlined_call_operand.hbm [shape: f32[2,8,32], index: 2, kind: input, shape index: {}]   ;;  %s2961_s3 = inlined_call_operand.hbm [shape: f32[32,32], index: 3, kind: input, shape index: {}]   ;;  %s2962_s4 = inlined_call_operand.vmem [shape: f32[1,32], index: 4, kind: input, shape index: {}]   ;;  %s2963_s5 = inlined_call_operand.hbm [shape: f32[32,32], index: 5, kind: input, shape index: {}]   ;;  %s2964_s6 = inlined_call_operand.vmem [shape: f32[1,32], index: 6, kind: input, shape index: {}]   ;;  %s2965_s7 = inlined_call_operand.hbm [shape: f32[32,32], index: 7, kind: input, shape index: {}]   ;;  %s2966_s8 = inlined_call_operand.vmem [shape: f32[1,32], index: 8, kind: input, shape index: {}]   ;;  %s2967_s9 = inlined_call_operand.hbm [shape: f32[32,32], index: 9, kind: input, shape index: {}]   ;;  %s2968_s10 = inlined_call_operand.vmem [shape: f32[1,32], index: 10, kind: input, shape index: {}]   ;;  %s2969_s11 = inlined_call_operand.hbm [shape: f32[2,8,32], index: 11, kind: output, shape index: {}]  }
   0x1   :  { %2990 = sst [smem:[#allocation25_spill]] %s2958_s0 }
   0x2   :  { %2991 = sst [smem:[#allocation26_spill]] %s2959_s1 }
   0x3   :  { %2992 = sst [smem:[#allocation27_spill]] %s2961_s3 }
   0x4   :  { %2993 = sst [smem:[#allocation28_spill]] %s2965_s7 }
   0x5   :  { %2994 = sst [smem:[#allocation29_spill]] %s2968_s10 }
   0x6   :  { %2995 = sst [smem:[#allocation30_spill]] %s2969_s11 }
   0x7   :  { %16 = vsyncpa [#allocation3], 0 }
   0x8   :  { %18 = vsyncpa [#allocation3 + $0x1], 0 }
   0x9   :  { %19 = vsyncpa [#allocation6], 0 }
   0xa   :  { %21 = vsyncpa [#allocation6 + $0x1], 0 }
   0xb   :  { %22 = vsyncpa [#allocation9], 0 }
   0xc   :  { %23 = vsyncpa [#allocation12], 0 }
   0xd   :  { %24 = vsyncpa [#allocation4], 0 }
   0xe   :  { %26 = vsyncpa [#allocation4 + $0x1], 0  ;;  %s2559_s17 = smov 0   ;;  %s2561_s18 = smov 0  }
   0xf   :  { %s2563_s19 = smov 0   ;;  %s2565_s20 = smov 0  }
  0x10 LB: > { %2996 = sst [smem:[#allocation20_spill]] %s2470_s17  ;;  %s2484_s21 = smov [#allocation8]   ;;  %s2482_s20 = sphi %s2565_s20, %s3033_s20   ;;  %s2478_s19 = sphi %s2563_s19, %s3037_s19   ;;  %s2474_s18 = sphi %s2561_s18, %s3036_s18   ;;  %s2470_s17 = sphi %s2559_s17, %s3035_s17  }
  0x11   : > { %2997 = sst [smem:[#allocation21_spill]] %s2482_s20  ;;  %s321_s22 = sshll.u32 %s2484_s21, 4  ;;  %s322_s22 = int_to_ptr.vmem [resolvable:$true] %s321_s22 }
  0x12   : > { %s2580_s23 = sadd.s32 4294967295, %s2482_s20   ;;  %p1918_p0 = scmp.ge.s32.totalorder %s2482_s20, 1 }
  0x13   : > { %p2982_p1 = scmp.eq.s32.totalorder %s2580_s23, 0  ;;  %p309_p2 = scmp.lt.s32.totalorder %s2482_s20, 3 }
  0x14   : > { %s2485_s25 = smov [#allocation11]   ;;  %s2229_s28 = scalar_lea.vmem %s322_s22, 512 }
  0x15   : > { %p2585_p3 = pnand %p1918_p0, %p309_p2  ;;  %s353_s26 = sshll.u32 %s2485_s25, 4  ;;  %s354_s26 = int_to_ptr.vmem [resolvable:$true] %s353_s26 }
  0x16   : > { %p2230_p8 = scmp.ne.s32.totalorder %s322_s22, %s2229_s28  ;;  %p2237_p11 = scmp.lt.s32.totalorder %s322_s22, %s322_s22 }
  0x17   : > { %s2998_s24 = scalar_select %p2585_p3, 1, 0 }
  0x18   : > { %p2122_p5 = pneg %p2585_p3  ;;  %p2238_p12 = scmp.lt.s32.totalorder %s2229_s28, %s2229_s28 }
  0x1a   : > { %p2594_p6 = pnand %p2122_p5, %p2982_p1  ;;  %p2239_p13 = por %p2238_p12, %p2237_p11 }
  0x1c   : > { %s2999_s27 = scalar_select %p2594_p6, 1, 0 }
  0x1d   : > { %p2970_p7 = pneg %p2594_p6 }
  0x1f   : > { %p2232_p9 = pnand %p2230_p8, %p2970_p7 }
  0x21   : > { %p2233_p10 = pneg %p2232_p9 }
  0x23   : > { %p2240_p0 = pnand %p2239_p13, %p2233_p10 }
  0x25   : > { %2243 = shalt.err (!%p2240_p0)
}
  0x26   : > { %s2971_s29 = smov 128   ;;  %s2973_s30 = smov 8  }
  0x27   : > { %s3000_s3 = sld [smem:[#allocation27_spill]]  ;;  %s2255_s14 = scalar_lea.vmem %s354_s26, 512 }
  0x28   : > { %p2256_p2 = scmp.ne.s32.totalorder %s354_s26, %s2255_s14  ;;  %p2263_p9 = scmp.lt.s32.totalorder %s354_s26, %s354_s26 }
  0x29   : > { %p2264_p10 = scmp.lt.s32.totalorder %s2255_s14, %s2255_s14 }
  0x2a   : > { %p2258_p5 = pnand %p2256_p2, %p2970_p7 }
  0x2b   : > { %p2265_p11 = por %p2264_p10, %p2263_p9 }
  0x2c   : > { %p2259_p8 = pneg %p2258_p5 }
  0x2d   : > { %2125 = dma.hbm_to_vmem [thread:$0]  (!%p2594_p6), %s3000_s3, 512, %s322_s22, [#allocation9], %s2971_s29, %s2971_s29, %s2973_s30  }
  0x2e   : > { %p2266_p12 = pnand %p2265_p11, %p2259_p8 }
  0x30   : > { %2269 = shalt.err (!%p2266_p12)
}
  0x31   : > { %s3001_s7 = sld [smem:[#allocation28_spill]]  ;;  %s1917_s21 = sadd.s32 4294967294, %s2482_s20  }
  0x32   : > { %s2624_s22 = sadd.s32 1, %s2482_s20   ;;  %s39_s28 = sadd.s32 1, %s2478_s19 }
  0x33   : > { %3002 = sst [smem:[#allocation22_spill]] %s2624_s22  ;;  %s36_s25 = ssub.s32 %s2482_s20, %s2624_s22 }
  0x34   : > { %p37_p13 = scmp.eq.s32.totalorder %s36_s25, 0  ;;  %p46_p0 = scmp.ne.s32.totalorder %s2478_s19, %s2474_s18 }
  0x35   : > { %p47_p2 = scmp.eq.s32.totalorder %s2482_s20, 0  ;;  %p52_p5 = scmp.ne.s32.totalorder %s2474_s18, %s2470_s17 }
  0x36   : > { %s2635_s12 = scalar_select %p37_p13, %s2478_s19, %s39_s28  }
  0x37   : > { %2131 = dma.hbm_to_vmem [thread:$0]  (!%p2594_p6), %s3001_s7, 512, %s354_s26, [#allocation12], %s2971_s29, %s2971_s29, %s2973_s30  }
  0x38   : > { %3003 = sst [smem:[#allocation23_spill]] %s2635_s12  ;;  %p48_p8 = por %p47_p2, %p46_p0 }
  0x39   : > { %p2639_p9 = por %p2982_p1, %p52_p5  ;;  %p296_p10 = scmp.eq.s32.totalorder %s2580_s23, 1 }
  0x3a   : > { %p302_p11 = scmp.eq.s32.totalorder %s1917_s21, 1  ;;  %p2153_p12 = scmp.lt.s32.totalorder %s2482_s20, 2 }
  0x3b   : > { %s3004_s13 = scalar_select %p2639_p9, 1, 0 }
  0x3c   : > { %s2975_s26 = sand.u32 1, %s2478_s19   ;;  %p2646_p4 = por %p296_p10, %p46_p0 }
  0x3d   : > { %p2650_p7 = por %p302_p11, %p52_p5  ;;  %s2656_s16 = sshll.u32 %s2975_s26, 3 }
  0x3e   : > { %s3005_s14 = scalar_select %p2646_p4, 1, 0 }
  0x3f   : > { %s3006_s15 = scalar_select %p2650_p7, 1, 0 }
  0x40   : > { %s2659_s25 = sshll.u32 %s2482_s20, 7  ;;  %p2661_p13 = pnand %p2153_p12, %p48_p8 }
  0x41   : > { %3007 = sst [smem:[#allocation24_spill]] %s3006_s15  ;;  %s404_s21 = sand.u32 1, %s2482_s20  }
  0x42   : > { %s3009_s1 = sld [smem:[#allocation26_spill]]  ;;  %s408_s26 = scalar_lea.vmem [#allocation5], %s2656_s16 }
  0x43   : > { %s415_s7 = sshll.u32 %s408_s26, 4  ;;  %s2488_s12 = smov [#allocation10]   ;;  %s2673_s7 = int_to_ptr.vmem [resolvable:$true] %s415_s7 }
  0x44   : > { %s337_s22 = sshll.u32 %s2488_s12, 4  ;;  %s2675_s15 = scalar_lea.sflag [#allocation6], %s404_s21  ;;  %s338_s22 = int_to_ptr.vmem [resolvable:$true] %s337_s22 }
  0x45   : > { %p2681_p2 = pneg %p2661_p13 }
  0x47   : > { %s3010_s20 = scalar_select %p2681_p2, 1, 0 }
  0x48   : > { %s2670_s3 = scalar_lea.hbm %s3009_s1, %s2659_s25  ;;  %s2275_s26 = scalar_lea.hbm %s3009_s1, 256 }
  0x49   : > { %s2270_s17 = scalar_lea.hbm %s2670_s3, 128  ;;  %p2276_p10 = scmp.lt.s32.totalorder %s2670_s3, %s3009_s1 }
  0x4a   : > { %p2271_p0 = scmp.ne.s32.totalorder %s2670_s3, %s2270_s17  ;;  %p2277_p11 = scmp.lt.s32.totalorder %s2275_s26, %s2270_s17 }
  0x4c   : > { %p2273_p5 = pnand %p2681_p2, %p2271_p0  ;;  %p2278_p12 = por %p2277_p11, %p2276_p10 }
  0x4e   : > { %p2274_p8 = pneg %p2273_p5 }
  0x50   : > { %p2279_p1 = pnand %p2278_p12, %p2274_p8 }
  0x52   : > { %2282 = shalt.err (!%p2279_p1)
}
  0x53   : > { %s2283_s12 = scalar_lea.vmem %s2673_s7, 128  ;;  %s2489_s21 = smov [#allocation5]  }
  0x54   : > { %p2284_p7 = scmp.ne.s32.totalorder %s2673_s7, %s2283_s12  ;;  %s2288_s29 = sshll.u32 %s2489_s21, 4  ;;  %s2289_s29 = int_to_ptr.vmem [resolvable:$false] %s2288_s29 }
  0x55   : > { %s2290_s30 = scalar_lea.vmem %s2289_s29, 256  ;;  %p2291_p4 = scmp.lt.s32.totalorder %s2673_s7, %s2289_s29 }
  0x56   : > { %p2286_p0 = pnand %p2284_p7, %p2681_p2  ;;  %p2292_p9 = scmp.lt.s32.totalorder %s2290_s30, %s2283_s12 }
  0x58   : > { %p2287_p5 = pneg %p2286_p0  ;;  %p2293_p3 = por %p2292_p9, %p2291_p4 }
  0x5a   : > { %p2294_p6 = pnand %p2293_p3, %p2287_p5 }
  0x5c   : > { %2297 = shalt.err (!%p2294_p6)
}
  0x5d   : > { %2141 = dma.hbm_to_vmem [thread:$0]  (!%p2661_p13), %s2670_s3, 128, %s2673_s7, %s2675_s15  }
  0x5e   : > { %s2309_s10 = scalar_lea.vmem %s338_s22, 512  ;;  %p3011_p7 = scmp.ne.s32.totalorder %s2999_s27, 0 }
  0x5f   : > { %p2310_p1 = scmp.ne.s32.totalorder %s338_s22, %s2309_s10  ;;  %p2317_p12 = scmp.lt.s32.totalorder %s338_s22, %s338_s22 }
  0x60   : > { %p3012_p8 = pneg %p3011_p7  ;;  %p2318_p0 = scmp.lt.s32.totalorder %s2309_s10, %s2309_s10 }
  0x62   : > { %p2312_p10 = pnand %p2310_p1, %p3012_p8  ;;  %p2319_p2 = por %p2318_p0, %p2317_p12 }
  0x64   : > { %p2313_p11 = pneg %p2312_p10 }
  0x66   : > { %p2320_p4 = pnand %p2319_p2, %p2313_p11 }
  0x68   : > { %2323 = shalt.err (!%p2320_p4)
}
  0x69   : > { %s3013_s11 = smov 8   ;;  %s3014_s17 = smov 128  }
  0x6a   : > { %2128 = dma.hbm_to_vmem [thread:$0]  (!%p3011_p7), %s2963_s5, 512, %s338_s22, [#allocation9], %s3014_s17, %s3014_s17, %s3013_s11  }
  0x6b   : > { %s2490_s3 = smov [#allocation13]   ;;  %p3015_p6 = pmov %p3012_p8 }
  0x6c   : > { %s369_s7 = sshll.u32 %s2490_s3, 4  ;;  %s370_s7 = int_to_ptr.vmem [resolvable:$true] %s369_s7 }
  0x6d   : > { %s2335_s21 = scalar_lea.vmem %s370_s7, 512  ;;  %p2343_p5 = scmp.lt.s32.totalorder %s370_s7, %s370_s7 }
  0x6e   : > { %p2336_p3 = scmp.ne.s32.totalorder %s370_s7, %s2335_s21  ;;  %p2344_p1 = scmp.lt.s32.totalorder %s2335_s21, %s2335_s21 }
  0x70   : > { %p2338_p9 = pnand %p2336_p3, %p3015_p6  ;;  %p2345_p8 = por %p2344_p1, %p2343_p5 }
  0x72   : > { %p2339_p2 = pneg %p2338_p9 }
  0x74   : > { %p2346_p10 = pnand %p2345_p8, %p2339_p2 }
  0x76   : > { %2349 = shalt.err (!%p2346_p10)
}
  0x77   : > { %2134 = dma.hbm_to_vmem [thread:$0]  (!%p3011_p7), %s2967_s9, 512, %s370_s7, [#allocation12], %s3014_s17, %s3014_s17, %s3013_s11  }
  0x78   : > { %s3016_s0 = sld [smem:[#allocation25_spill]]  ;;  %s390_s27 = scalar_lea.vmem [#allocation2], %s2656_s16 }
  0x79   : > { %s397_s12 = sshll.u32 %s390_s27, 4  ;;  %s3017_s3 = sand.u32 1, %s2478_s19   ;;  %s398_s12 = int_to_ptr.vmem [resolvable:$true] %s397_s12 }
  0x7a   : > { %s387_s21 = scalar_lea.sflag [#allocation3], %s3017_s3  ;;  %p3018_p12 = scmp.ne.s32.totalorder %s3010_s20, 0 }
  0x7e   : > { %s2730_s26 = scalar_lea.hbm %s3016_s0, %s2659_s25  ;;  %s2355_s17 = scalar_lea.hbm %s3016_s0, 256 }
  0x7f   : > { %s2350_s1 = scalar_lea.hbm %s2730_s26, 128  ;;  %p2356_p7 = scmp.lt.s32.totalorder %s2730_s26, %s3016_s0 }
  0x80   : > { %p2351_p11 = scmp.ne.s32.totalorder %s2730_s26, %s2350_s1  ;;  %p2357_p3 = scmp.lt.s32.totalorder %s2355_s17, %s2350_s1 }
  0x82   : > { %p2353_p0 = pnand %p2351_p11, %p3018_p12  ;;  %p2358_p6 = por %p2357_p3, %p2356_p7 }
  0x84   : > { %p2354_p4 = pneg %p2353_p0 }
  0x86   : > { %p2359_p9 = pnand %p2358_p6, %p2354_p4 }
  0x88   : > { %2362 = shalt.err (!%p2359_p9)
}
  0x89   : > { %s2363_s30 = scalar_lea.vmem %s398_s12, 128  ;;  %s2491_s10 = smov [#allocation2]  }
  0x8a   : > { %p2364_p2 = scmp.ne.s32.totalorder %s398_s12, %s2363_s30  ;;  %s2368_s27 = sshll.u32 %s2491_s10, 4  ;;  %s2369_s27 = int_to_ptr.vmem [resolvable:$false] %s2368_s27 }
  0x8b   : > { %s2370_s3 = scalar_lea.vmem %s2369_s27, 256  ;;  %p2371_p8 = scmp.lt.s32.totalorder %s398_s12, %s2369_s27 }
  0x8c   : > { %p2366_p5 = pnand %p2364_p2, %p3018_p12  ;;  %p2372_p10 = scmp.lt.s32.totalorder %s2370_s3, %s2363_s30 }
  0x8e   : > { %p2367_p1 = pneg %p2366_p5  ;;  %p2373_p11 = por %p2372_p10, %p2371_p8 }
  0x90   : > { %p2374_p0 = pnand %p2373_p11, %p2367_p1 }
  0x92   : > { %2377 = shalt.err (!%p2374_p0)
}
  0x93   : > { %2138 = dma.hbm_to_vmem [thread:$0]  (!%p2661_p13), %s2730_s26, 128, %s398_s12, %s387_s21  }
  0x94   : > { %s431_s11 = scalar_lea.hbm %s2960_s2, %s2659_s25  ;;  %s426_s17 = scalar_lea.vmem [#allocation7], %s2656_s16 }
  0x95   : > { %s433_s7 = sshll.u32 %s426_s17, 4  ;;  %s2378_s29 = scalar_lea.hbm %s431_s11, 128  ;;  %s434_s7 = int_to_ptr.vmem [resolvable:$true] %s433_s7 }
  0x96   : > { %p2379_p4 = scmp.ne.s32.totalorder %s431_s11, %s2378_s29  ;;  %s2383_s27 = scalar_lea.hbm %s2960_s2, 256 }
  0x97   : > { %p2384_p6 = scmp.lt.s32.totalorder %s431_s11, %s2960_s2  ;;  %p2385_p9 = scmp.lt.s32.totalorder %s2383_s27, %s2378_s29 }
  0x98   : > { %p2381_p7 = pnand %p2379_p4, %p3018_p12 }
  0x99   : > { %p2386_p2 = por %p2385_p9, %p2384_p6 }
  0x9a   : > { %p2382_p3 = pneg %p2381_p7 }
  0x9c   : > { %p2387_p5 = pnand %p2386_p2, %p2382_p3 }
  0x9e   : > { %2390 = shalt.err (!%p2387_p5)
}
  0x9f   : > { %s2391_s16 = scalar_lea.vmem %s434_s7, 128  ;;  %s2492_s25 = smov [#allocation7]  }
  0xa0   : > { %p2392_p1 = scmp.ne.s32.totalorder %s434_s7, %s2391_s16  ;;  %s2396_s26 = sshll.u32 %s2492_s25, 4  ;;  %s2397_s26 = int_to_ptr.vmem [resolvable:$false] %s2396_s26 }
  0xa1   : > { %s2398_s12 = scalar_lea.vmem %s2397_s26, 256  ;;  %p2399_p11 = scmp.lt.s32.totalorder %s434_s7, %s2397_s26 }
  0xa2   : > { %p2394_p8 = pnand %p2392_p1, %p3018_p12  ;;  %p2400_p0 = scmp.lt.s32.totalorder %s2398_s12, %s2391_s16 }
  0xa4   : > { %p2395_p10 = pneg %p2394_p8  ;;  %p2401_p4 = por %p2400_p0, %p2399_p11 }
  0xa6   : > { %p2402_p7 = pnand %p2401_p4, %p2395_p10 }
  0xa8   : > { %2405 = shalt.err (!%p2402_p7)
}
  0xa9   : > { %2144 = dma.hbm_to_vmem [thread:$0]  (!%p2661_p13), %s431_s11, 128, %s434_s7, %s2675_s15  }
  0xaa   : > { %p3019_p3 = scmp.ne.s32.totalorder %s2998_s24, 0 }
  0xab   : > { %s2772_s0 = sand.u32 (!%p3019_p3), 1, %s2474_s18   ;;  %p3020_p12 = scmp.ne.s32.totalorder (!%p3019_p3), %s3004_s13, 0 }
  0xac   : > { %442 = sbr.rel (%p3019_p3) target bundleno = 2631 (0xa47), region = 64  ;;  %s2775_s20 = sshll.u32 (!%p3019_p3), %s2772_s0, 3 }
  0xad   : > { %s445_s21 = scalar_lea.sflag (!%p3019_p3), [#allocation3], %s2772_s0  ;;  %s448_s1 = scalar_lea.vmem (!%p3019_p3), [#allocation2], %s2775_s20 }
  0xb1   : > { %2449 = dma.done.wait (%p3020_p12), %s445_s21, 128  }
  0xb2   : > { %2451 = vsyncadd (%p3020_p12), %s445_s21, 4294967168  ;;  %s453_s24 = sand.u32 1, %s2580_s23   ;;  %s457_s28 = scalar_lea.vmem [#allocation5], %s2775_s20 }
  0xb3   : > { %s454_s15 = scalar_lea.sflag [#allocation6], %s453_s24 }
  0xb4   : > { %2453 = dma.done.wait (%p3020_p12), %s454_s15, 256  }
  0xb5   : > { %2455 = vsyncadd (%p3020_p12), %s454_s15, 4294967040  ;;  %s466_s22 = scalar_lea.vmem [#allocation7], %s2775_s20  ;;  %p3021_p13 = scmp.eq.s32.totalorder %s2580_s23, 0 }
  0xb7   : > { %2457 = dma.done.wait (%p3021_p13), [#allocation9], 1024   ;;  %p3022_p6 = pmov %p3021_p13 }
  0xb9   : > { %2459 = vsyncadd (%p3022_p6), [#allocation9], 4294966272  ;;  %p3023_p9 = pmov %p3022_p6 }
  0xba   : > { %p3024_p2 = pmov %p3022_p6 }
  0xbb   : > { %2461 = dma.done.wait (%p3023_p9), [#allocation12], 1024  }
  0xbc   : > { %2463 = vsyncadd (%p3024_p2), [#allocation12], 4294966272  ;;  %v2493_v0 = vmov 0.0   ;;  %vm2494_vm0 = vmmov 0   ;;  %v537_v1 = vld [vmem:[#allocation8 + $0x18] sm:$0xff]  ;;  %v536_v3 = vld [vmem:[#allocation8 + $0x10] sm:$0xff] }
  0xbd   : > { %2005 = vmatprep.subr.mxu0 %v2493_v0  ;;  %2016 = vmatprep.subr.mxu1 %v2493_v0  ;;  %v623_v2 = vld [vmem:[#allocation10 + $0x18] sm:$0xff]  ;;  %v622_v4 = vld [vmem:[#allocation10 + $0x10] sm:$0xff]  ;;  %v535_v5 = vld [vmem:[#allocation8 + $0x8] sm:$0xff]  ;;  %vm545_vm1 = vcmask 261120   ;;  %vm792_vm2 = vcmask 64512   ;;  %s2495_s29 = smov 120  }
  0xbe   : > { %2013 = vmatprep.mubr.msk.f32.mxu0 %vm2494_vm0, %v2493_v0  ;;  %2024 = vmatprep.mubr.msk.f32.mxu1 %vm2494_vm0, %v2493_v0  ;;  %v621_v6 = vld [vmem:[#allocation10 + $0x8] sm:$0xff]  ;;  %v534_v7 = vld [vmem:[#allocation8] sm:$0xff]  ;;  %v531_v9 = vld [vmem:[%s448_s1] sm:$0xff]  ;;  %s2496_s27 = smov 112   ;;  %s2497_s3 = smov 104  }
  0xbf   : > { %2006 = vmatpush3.msra.mxu0 %v537_v1  ;;  %2017 = vmatpush3.msra.mxu1 %v623_v2  ;;  %v620_v8 = vld [vmem:[#allocation10] sm:$0xff]  ;;  %v707_v11 = vld [vmem:[#allocation11 + $0x18] sm:$0xff]  ;;  %v706_v12 = vld [vmem:[#allocation11 + $0x10] sm:$0xff]  ;;  %s3025_s26 = sld [smem:[#allocation29_spill]]  ;;  %s1963_s12 = sshll.u32 %s2580_s23, 7 }
  0xc0   : > { %2007 = vmatprep.subr.mxu0 %v2493_v0  ;;  %2018 = vmatprep.subr.mxu1 %v2493_v0  ;;  %v532_v10 = vld [vmem:[%s457_s28] sm:$0xff]  ;;  %v533_v15 = vld [vmem:[%s466_s22] sm:$0xff]  ;;  %s530_s21 = scalar_lea.vmem [#allocation14], %s2775_s20  ;;  %s3026_s28 = sld [smem:[#allocation30_spill]] }
  0xc1   : > { %2008 = vmatpush3.msra.mxu0 %v536_v3  ;;  %2019 = vmatpush3.msra.mxu1 %v622_v4  ;;  %v705_v13 = vld [vmem:[#allocation11 + $0x8] sm:$0xff]  ;;  %v704_v14 = vld [vmem:[#allocation11] sm:$0xff]  ;;  %v1939_v16 = vld [vmem:[%s2962_s4] ss:$0 sm:$0xff]  ;;  %s1766_s1 = sshll.u32 %s530_s21, 4  ;;  %s1753_s13 = scalar_lea.sflag [#allocation4], %s2772_s0  ;;  %s1767_s1 = int_to_ptr.vmem [resolvable:$true] %s1766_s1 }
  0xc2   : > { %2009 = vmatprep.subr.mxu0 %v2493_v0  ;;  %2020 = vmatprep.subr.mxu1 %v2493_v0  ;;  %v1941_v17 = vld [vmem:[%s2964_s6] ss:$0 sm:$0xff]  ;;  %v789_v50 = vld [vmem:[#allocation13 + $0x8] sm:$0xff]  ;;  %v788_v55 = vld [vmem:[#allocation13] sm:$0xff]  ;;  %s2406_s11 = scalar_lea.vmem %s1767_s1, 128  ;;  %p3027_p1 = scmp.ne.s32.totalorder %s3005_s14, 0 }
  0xc3   : > { %2010 = vmatpush3.msra.mxu0 %v535_v5  ;;  %2021 = vmatpush3.msra.mxu1 %v621_v6  ;;  %v1943_v25 = vld [vmem:[%s2966_s8] ss:$0 sm:$0xff]  ;;  %p2407_p5 = scmp.ne.s32.totalorder %s1767_s1, %s2406_s11  ;;  %s2498_s17 = smov [#allocation14]  }
  0xc4   : > { %2011 = vmatprep.subr.mxu0 %v2493_v0  ;;  %2022 = vmatprep.subr.mxu1 %v2493_v0  ;;  %s2410_s23 = sshll.u32 %s2498_s17, 4  ;;  %s2411_s23 = int_to_ptr.vmem [resolvable:$false] %s2410_s23 }
  0xc5   : > { %2012 = vmatpush3.msra.mxu0 %v534_v7  ;;  %2023 = vmatpush3.msra.mxu1 %v620_v8  ;;  %p2408_p8 = pnand %p2407_p5, %p3027_p1  ;;  %s2412_s20 = scalar_lea.vmem %s2411_s23, 256 }
  0xc6   : > { %2014 = vmatmul.mubr.msk.f32.vlgmr.msra.gmra.mxu0 %vm545_vm1, %v531_v9  ;;  %2025 = vmatmul.mubr.msk.f32.vlgmr.msra.gmra.mxu1 %vm545_vm1, %v532_v10  ;;  %s1764_s22 = scalar_lea.hbm %s3026_s28, %s1963_s12  ;;  %p2413_p11 = scmp.lt.s32.totalorder %s1767_s1, %s2411_s23 }
  0xc7   : > { %2038 = vmatprep.subr.mxu1 %v2493_v0  ;;  %2040 = vmatprep.mubr.msk.f32.mxu1 %vm2494_vm0, %v2493_v0  ;;  %p2409_p10 = pneg %p2408_p8  ;;  %p2414_p0 = scmp.lt.s32.totalorder %s2412_s20, %s2406_s11 }
  0xc8   : > { %2027 = vmatprep.subr.mxu0 %v2493_v0  ;;  %2035 = vmatprep.mubr.msk.f32.mxu0 %vm2494_vm0, %v2493_v0 }
  0xc9   : > { %2028 = vmatpush3.msra.mxu0 %v707_v11  ;;  %p2415_p4 = por %p2414_p0, %p2413_p11 }
  0xca   : > { %2029 = vmatprep.subr.mxu0 %v2493_v0 }
  0xcb   : > { %2030 = vmatpush3.msra.mxu0 %v706_v12  ;;  %p2416_p7 = pnand %p2415_p4, %p2409_p10 }
  0xcc   : > { %2031 = vmatprep.subr.mxu0 %v2493_v0 }
  0xcd   : > { %2032 = vmatpush3.msra.mxu0 %v705_v13 }
  0xce   : > { %2033 = vmatprep.subr.mxu0 %v2493_v0 }
  0xcf   : > { %2034 = vmatpush3.msra.mxu0 %v704_v14 }
  0xd0   : > { %2036 = vmatmul.mubr.msk.f32.vlgmr.msra.gmra.mxu0 %vm545_vm1, %v533_v15  ;;  %2048 = vmatprep.subr.mxu0 %v2493_v0 }
  0xd1   : > { %2050 = vmatprep.mubr.msk.f32.mxu0 %vm2494_vm0, %v2493_v0 }
 0x186   : > { %v615_v18 = vpop.f32.mrf.mxu0  ;;  %v700_v19 = vpop.f32.mrf.mxu1 }
 0x187   : > { %v616_v20 = vadd.f32 %v1939_v16, %v615_v18  ;;  %v2837_v21 = vadd.f32 %v1941_v17, %v700_v19  ;;  %v790_v17 = vld [vmem:[#allocation13 + $0x10] sm:$0xff] }
 0x188   : > { %v2015_v22 = vpop.f32.mrf.mxu0  ;;  %v2026_v23 = vpop.f32.mrf.mxu1 }
 0x189   : > { %v2839_v24 = vmul.f32 0.35355338, %v616_v20  ;;  %955 = vrot.lane.b32.xlu0 %v2837_v21, %s2495_s29  ;;  %2039 = vmatpush3.xpose.msk.msra.mxu1 %vm792_vm2, %v2837_v21 }
 0x18a   : > { %2043 = vmatprep.subr.mxu1 %v2493_v0 }
 0x18c   : > { %2041 = vmatmul.mubr.msk.f32.vlgmr.msra.gmra.mxu1 %vm792_vm2, %v2839_v24 }
 0x18d   : > { %953 = vrot.lane.b32.xlu0 %v2839_v24, %s2495_s29  ;;  %2045 = vmatprep.mubr.msk.f32.mxu1 %vm2494_vm0, %v2493_v0 }
 0x190   : > { %v784_v26 = vpop.f32.mrf.mxu0 }
 0x191   : > { %v2855_v27 = vadd.f32 %v1943_v25, %v784_v26 }
 0x192   : > { %v2037_v28 = vpop.f32.mrf.mxu0 }
 0x193   : > { %2044 = vmatpush3.msra.mxu1 %v2855_v27 }
 0x194   : > { %2053 = vmatprep.subr.mxu1 %v2493_v0 }
 0x1fb   : > { %v956_v29 = vpop.permute.xlu0 %955 }
 0x1fc   : > { %2049 = vmatpush3.xpose.msk.msra.mxu0 %vm792_vm2, %v956_v29  ;;  %v791_v29 = vld [vmem:[#allocation13 + $0x18] sm:$0xff] }
 0x1fd   : > { %2058 = vmatprep.subr.mxu0 %v2493_v0 }
 0x1ff   : > { %v954_v30 = vpop.permute.xlu0 %953 }
 0x200   : > { %2051 = vmatmul.mubr.msk.f32.vlgmr.msra.gmra.mxu0 %vm792_vm2, %v954_v30 }
 0x201   : > { %2060 = vmatprep.mubr.msk.f32.mxu0 %vm2494_vm0, %v2493_v0  ;;  %2059 = vmatpush3.msra.mxu0 %v789_v50 }
 0x202   : > { %2068 = vmatprep.subr.mxu0 %v2493_v0 }
 0x24c   : > { %v865_v31 = vpop.f32.mrf.mxu1 }
 0x24d   : > { %v869_v32 = vsel %vm792_vm2, %v865_v31, -inf }
 0x24e   : > { %870 = vmax.xlane.f32.xlu1 %v869_v32  ;;  %v2042_v33 = vpop.f32.mrf.mxu1 }
 0x2c0   : > { %v1027_v34 = vpop.f32.mrf.mxu0 }
 0x2c1   : > { %v1031_v35 = vsel %vm792_vm2, %v1027_v34, -inf }
 0x2c2   : > { %1032 = vmax.xlane.f32.xlu1 %v1031_v35  ;;  %v2052_v36 = vpop.f32.mrf.mxu0 }
 0x2d7   : > { %v871_v37 = vpop.xlane.xlu1 %870 }
 0x2d8   : > { %v872_v38 = vsub.f32 %v865_v31, %v871_v37 }
 0x2da   : > { %v873_v39 = vmul.f32 1.442695, %v872_v38 }
 0x2dc   : > { %2202 = vpow2.f32 %v873_v39  ;;  %v1961_v39 = vld [vmem:[%s3025_s26] ss:$0 sm:$0xff] }
 0x2e9   : > { %v2203_v40 = vpop.eup %2202 }
 0x2ea   : > { %v875_v41 = vsel %vm792_vm2, %v2203_v40, 0.0 }
 0x2eb   : > { %876 = vadd.xlane.f32.xlu0 %v875_v41 }
 0x301   : > { %1354 = vrot.lane.b32.xlu0 %v2855_v27, %s2496_s27 }
 0x34b   : > { %v1033_v42 = vpop.xlane.xlu1 %1032 }
 0x34c   : > { %v1034_v43 = vsub.f32 %v1027_v34, %v1033_v42 }
 0x34e   : > { %v1035_v44 = vmul.f32 1.442695, %v1034_v43 }
 0x350   : > { %2204 = vpow2.f32 %v1035_v44 }
 0x35d   : > { %v2205_v45 = vpop.eup %2204 }
 0x35e   : > { %v1037_v46 = vsel %vm792_vm2, %v2205_v45, 0.0 }
 0x35f   : > { %1038 = vadd.xlane.f32.xlu1 %v1037_v46 }
 0x370   : > { %1043 = vrot.lane.b32.xlu1 %v2855_v27, %s2495_s29 }
 0x374   : > { %v877_v47 = vpop.xlane.xlu0 %876  ;;  %1267 = vrot.lane.b32.xlu1 %v2837_v21, %s2496_s27 }
 0x375   : > { %2206 = vrcp.f32 %v877_v47 }
 0x378   : > { %1265 = vrot.lane.b32.xlu1 %v2839_v24, %s2496_s27  ;;  %v1355_v57 = vpop.permute.xlu0 %1354 }
 0x382   : > { %v2207_v48 = vpop.eup %2206 }
 0x383   : > { %v879_v49 = vmul.f32 %v2207_v48, %v2203_v40 }
 0x385   : > { %2046 = vmatmul.mubr.msk.f32.vlgmr.msra.gmra.mxu1 %vm792_vm2, %v879_v49 }
 0x386   : > { %2055 = vmatprep.mubr.msk.f32.mxu1 %vm2494_vm0, %v2493_v0 }
 0x3e8   : > { %v1039_v51 = vpop.xlane.xlu1 %1038 }
 0x3e9   : > { %2208 = vrcp.f32 %v1039_v51 }
 0x3ec   : > { %v1044_v52 = vpop.permute.xlu1 %1043 }
 0x3ed   : > { %2054 = vmatpush3.msra.mxu1 %v1044_v52 }
 0x3ee   : > { %2063 = vmatprep.subr.mxu1 %v2493_v0 }
 0x3f0   : > { %v1268_v59 = vpop.permute.xlu1 %1267 }
 0x3f4   : > { %v1266_v62 = vpop.permute.xlu1 %1265 }
 0x3f6   : > { %v2209_v53 = vpop.eup %2208 }
 0x3f7   : > { %v1041_v54 = vmul.f32 %v2209_v53, %v2205_v45 }
 0x3f9   : > { %2056 = vmatmul.mubr.msk.f32.vlgmr.msra.gmra.mxu1 %vm792_vm2, %v1041_v54 }
 0x3fa   : > { %2064 = vmatpush3.msra.mxu1 %v788_v55  ;;  %2065 = vmatprep.mubr.msk.f32.mxu1 %vm2494_vm0, %v2493_v0 }
 0x3fb   : > { %2073 = vmatprep.subr.mxu1 %v2493_v0 }
 0x445   : > { %v949_v56 = vpop.f32.mrf.mxu1 }
 0x446   : > { %2066 = vmatmul.mubr.msk.f32.vlgmr.msra.gmra.mxu1 %vm792_vm2, %v949_v56 }
 0x447   : > { %2074 = vmatpush3.msra.mxu1 %v1355_v57  ;;  %v2047_v58 = vpop.f32.mrf.mxu1  ;;  %2075 = vmatprep.mubr.msk.f32.mxu1 %vm2494_vm0, %v2493_v0 }
 0x448   : > { %2083 = vmatprep.subr.mxu1 %v2493_v0 }
 0x4b9   : > { %v1115_v60 = vpop.f32.mrf.mxu1 }
 0x4ba   : > { %2061 = vmatmul.mubr.msk.f32.vlgmr.msra.gmra.mxu0 %vm792_vm2, %v1115_v60 }
 0x4bb   : > { %2069 = vmatpush3.xpose.msk.msra.mxu0 %vm792_vm2, %v1268_v59  ;;  %v2057_v61 = vpop.f32.mrf.mxu1  ;;  %2070 = vmatprep.mubr.msk.f32.mxu0 %vm2494_vm0, %v2493_v0 }
 0x4bc   : > { %2078 = vmatprep.subr.mxu0 %v2493_v0 }
 0x4be   : > { %2071 = vmatmul.mubr.msk.f32.vlgmr.msra.gmra.mxu0 %vm792_vm2, %v1266_v62 }
 0x4bf   : > { %2080 = vmatprep.mubr.msk.f32.mxu0 %vm2494_vm0, %v2493_v0  ;;  %2079 = vmatpush3.msra.mxu0 %v790_v17 }
 0x4c0   : > { %2088 = vmatprep.subr.mxu0 %v2493_v0 }
 0x506   : > { %v1261_v63 = vpop.f32.mrf.mxu1 }
 0x508   : > { %v2067_v1 = vpop.f32.mrf.mxu1 }
 0x57a   : > { %v1188_v2 = vpop.f32.mrf.mxu0 }
 0x57b   : > { %v1262_v30 = vadd.f32 %v1261_v63, %v1188_v2 }
 0x57c   : > { %v2062_v3 = vpop.f32.mrf.mxu0 }
 0x57e   : > { %v1339_v4 = vpop.f32.mrf.mxu0 }
 0x57f   : > { %v1343_v5 = vsel %vm792_vm2, %v1339_v4, -inf }
 0x580   : > { %1344 = vmax.xlane.f32.xlu1 %v1343_v5  ;;  %v2072_v6 = vpop.f32.mrf.mxu0 }
 0x609   : > { %v1345_v7 = vpop.xlane.xlu1 %1344 }
 0x60a   : > { %v1346_v8 = vsub.f32 %v1339_v4, %v1345_v7 }
 0x60c   : > { %v1347_v9 = vmul.f32 1.442695, %v1346_v8 }
 0x60e   : > { %2210 = vpow2.f32 %v1347_v9 }
 0x61b   : > { %v2211_v10 = vpop.eup %2210 }
 0x61c   : > { %v1349_v11 = vsel %vm792_vm2, %v2211_v10, 0.0 }
 0x61d   : > { %1350 = vadd.xlane.f32.xlu0 %v1349_v11 }
 0x633   : > { %1506 = vrot.lane.b32.xlu0 %v2837_v21, %s2497_s3 }
 0x637   : > { %1504 = vrot.lane.b32.xlu0 %v2839_v24, %s2497_s3 }
 0x6a6   : > { %v1351_v12 = vpop.xlane.xlu0 %1350 }
 0x6a7   : > { %2212 = vrcp.f32 %v1351_v12 }
 0x6aa   : > { %v1507_v14 = vpop.permute.xlu0 %1506 }
 0x6ae   : > { %v1505_v16 = vpop.permute.xlu0 %1504 }
 0x6b4   : > { %v2213_v13 = vpop.eup %2212 }
 0x6b5   : > { %v1353_v15 = vmul.f32 %v2213_v13, %v2211_v10 }
 0x6b7   : > { %2076 = vmatmul.mubr.msk.f32.vlgmr.msra.gmra.mxu1 %vm792_vm2, %v1353_v15 }
 0x6b8   : > { %2084 = vmatpush3.xpose.msk.msra.mxu1 %vm792_vm2, %v1507_v14  ;;  %2085 = vmatprep.mubr.msk.f32.mxu1 %vm2494_vm0, %v2493_v0 }
 0x6b9   : > { %2093 = vmatprep.subr.mxu1 %v2493_v0 }
 0x6bb   : > { %2086 = vmatmul.mubr.msk.f32.vlgmr.msra.gmra.mxu1 %vm792_vm2, %v1505_v16 }
 0x6bc   : > { %2095 = vmatprep.mubr.msk.f32.mxu1 %vm2494_vm0, %v2493_v0  ;;  %2094 = vmatpush3.msra.mxu1 %v791_v29 }
 0x777   : > { %v1426_v18 = vpop.f32.mrf.mxu1 }
 0x778   : > { %2081 = vmatmul.mubr.msk.f32.vlgmr.msra.gmra.mxu0 %vm792_vm2, %v1426_v18 }
 0x779   : > { %v2077_v19 = vpop.f32.mrf.mxu1  ;;  %2090 = vmatprep.mubr.msk.f32.mxu0 %vm2494_vm0, %v2493_v0 }
 0x77b   : > { %v1578_v20 = vpop.f32.mrf.mxu1 }
 0x77c   : > { %v1582_v21 = vsel %vm792_vm2, %v1578_v20, -inf }
 0x77d   : > { %1583 = vmax.xlane.f32.xlu0 %v1582_v21  ;;  %v2087_v22 = vpop.f32.mrf.mxu1 }
 0x806   : > { %v1584_v23 = vpop.xlane.xlu0 %1583 }
 0x807   : > { %v1585_v24 = vsub.f32 %v1578_v20, %v1584_v23 }
 0x809   : > { %v1586_v25 = vmul.f32 1.442695, %v1585_v24 }
 0x80b   : > { %2214 = vpow2.f32 %v1586_v25 }
 0x818   : > { %v2215_v26 = vpop.eup %2214 }
 0x819   : > { %v1588_v28 = vsel %vm792_vm2, %v2215_v26, 0.0 }
 0x81a   : > { %1589 = vadd.xlane.f32.xlu1 %v1588_v28 }
 0x82b   : > { %1593 = vrot.lane.b32.xlu1 %v2855_v27, %s2497_s3 }
 0x838   : > { %v1499_v0 = vpop.f32.mrf.mxu0 }
 0x839   : > { %v1503_v31 = vadd.f32 %v1499_v0, %v1262_v30 }
 0x83a   : > { %v2082_v32 = vpop.f32.mrf.mxu0 }
 0x8a3   : > { %v1590_v33 = vpop.xlane.xlu1 %1589 }
 0x8a4   : > { %2216 = vrcp.f32 %v1590_v33 }
 0x8a7   : > { %v1594_v34 = vpop.permute.xlu1 %1593 }
 0x8a8   : > { %2089 = vmatpush3.msra.mxu0 %v1594_v34 }
 0x8b1   : > { %v2217_v35 = vpop.eup %2216 }
 0x8b2   : > { %v1592_v36 = vmul.f32 %v2217_v35, %v2215_v26 }
 0x8b4   : > { %2091 = vmatmul.mubr.msk.f32.vlgmr.msra.gmra.mxu0 %vm792_vm2, %v1592_v36 }
 0x974   : > { %v1665_v37 = vpop.f32.mrf.mxu0 }
 0x975   : > { %2096 = vmatmul.mubr.msk.f32.vlgmr.msra.gmra.mxu1 %vm792_vm2, %v1665_v37 }
 0x976   : > { %v2092_v27 = vpop.f32.mrf.mxu0 }
 0xa35   : > { %v1738_v38 = vpop.f32.mrf.mxu1 }
 0xa36   : > { %v1742_v40 = vadd.f32 %v1738_v38, %v1503_v31 }
 0xa37   : > { %v2097_v41 = vpop.f32.mrf.mxu1 }
 0xa38   : > { %v1750_v42 = vadd.f32 %v1961_v39, %v1742_v40 }
 0xa3a   : > { %1751 = vst.msk [vmem:[%s530_s21] sm:$0xff] %vm545_vm1, %v1750_v42 }
 0xa3b   : > { %2419 = shalt.err (!%p2416_p7)
}
 0xa3c   : > { %s2420_s7 = scalar_lea.hbm %s1764_s22, 128  ;;  %s2424_s30 = scalar_lea.hbm %s3026_s28, 256 }
 0xa3d   : > { %p2421_p3 = scmp.ne.s32.totalorder %s1764_s22, %s2420_s7  ;;  %p2425_p6 = scmp.lt.s32.totalorder %s1764_s22, %s3026_s28 }
 0xa3e   : > { %p2426_p9 = scmp.lt.s32.totalorder %s2424_s30, %s2420_s7 }
 0xa3f   : > { %p2422_p12 = pnand %p2421_p3, %p3027_p1 }
 0xa40   : > { %p2427_p2 = por %p2426_p9, %p2425_p6 }
 0xa41   : > { %p2423_p13 = pneg %p2422_p12 }
 0xa43   : > { %p2428_p5 = pnand %p2427_p2, %p2423_p13 }
 0xa45   : > { %2431 = shalt.err (!%p2428_p5)
}
 0xa46   : > { %2120 = dma.vmem_to_hbm [thread:$0]  (%p3027_p1), %s1767_s1, 128, %s1764_s22, %s1753_s13  }
 0xa47 PF: > { %s3028_s3 = sld [smem:[#allocation20_spill]] }
 0xa48   : > { %s3029_s16 = sld [smem:[#allocation24_spill]] }
 0xa49   : > { %s3030_s25 = sld [smem:[#allocation21_spill]] }
 0xa4d   : > { %s1778_s26 = sand.u32 1, %s3028_s3  }
 0xa4e   : > { %p3031_p8 = scmp.ne.s32.totalorder %s3029_s16, 0  ;;  %s1779_s12 = scalar_lea.sflag [#allocation4], %s1778_s26 }
 0xa4f   : > { %p3032_p10 = scmp.ge.s32.totalorder %s3030_s25, 2 }
 0xa51   : > { %p2146_p11 = pnand %p3032_p10, %p3031_p8 }
 0xa53   : > { %p2147_p0 = pneg %p2146_p11 }
 0xa55   : > { %2465 = dma.done.wait (%p2147_p0), %s1779_s12, 128  }
 0xa56   : > { %2467 = vsyncadd (%p2147_p0), %s1779_s12, 4294967168  ;;  %s3033_s20 = sld [smem:[#allocation22_spill]]  ;;  %s3035_s17 = smov %s2474_s18 }
 0xa57   : > { %s3034_s21 = sld [smem:[#allocation23_spill]]  ;;  %s3036_s18 = smov %s2478_s19 }
 0xa5c   : > { %p29_p4 = scmp.ge.s32.totalorder %s3033_s20, 4  }
 0xa5d   : > { %s3037_s19 = smov %s3034_s21 }
 0xa5e   :  { %31 = sbr.rel (!%p29_p4) target bundleno = 16 (0x10), region = 149 }
 0xa63   :  { %1784 = vsyncpa [#allocation3], 1 }
 0xa64   :  { %1786 = vsyncpa [#allocation3 + $0x1], 1 }
 0xa65   :  { %1787 = vsyncpa [#allocation6], 1 }
 0xa66   :  { %1789 = vsyncpa [#allocation6 + $0x1], 1 }
 0xa67   :  { %1790 = vsyncpa [#allocation9], 1 }
 0xa68   :  { %1791 = vsyncpa [#allocation12], 1 }
 0xa69   :  { %1792 = vsyncpa [#allocation4], 1 }
 0xa6a   :  { %1794 = vsyncpa [#allocation4 + $0x1], 1 }

</bundles_post_ra>
